<compile_context>
chip_gen: v5e
topology: v5e:2x2
jax: 0.10.0
libtpu: 0.0.40
codegen_flags: <defaults>
</compile_context>

<pallas_src>
from functools import partial

import jax
import jax.numpy as jnp
from jax import lax
from jax.experimental import pallas as pl
from jax.experimental.pallas import tpu as pltpu

LANES = 128
DEFAULT_MAX_TILE_BYTES = 4 * 1024 * 1024   # per input, per pipeline buffer
VMEM_LIMIT_BYTES = 48 * 1024 * 1024        # actual use: 2 in x 2 buf x 4 MiB


def _round_up(x, m):
    return ((x + m - 1) // m) * m


def _combinator_kernel(pred_ref, tgt_ref,        # VMEM (tile_rows, 128) inputs
                       sq_ref, l1_ref,           # VMEM (slice_rows, 128) f32 partial sums
                       *, tile_rows, slice_rows, rows, steps_per_split, needs_mask):
    c = pl.program_id(0)        # "parallel" split (one per TensorCore on v7x)
    i = pl.program_id(1)        # "arbitrary" reduction axis

    @pl.when(i == 0)
    def _():
        sq_ref[...] = jnp.zeros_like(sq_ref)
        l1_ref[...] = jnp.zeros_like(l1_ref)

    # Nominal (unclamped) first row covered by this grid step.
    start_row = (c * steps_per_split + i) * tile_rows
    num_slices = tile_rows // slice_rows
    unroll = next(u for u in (8, 4, 2, 1) if num_slices % u == 0)
    outer = num_slices // unroll

    def accumulate(masked):
        if masked:
            # Hoisted out of the loop (JAX does not CSE broadcasts).
            row_iota = lax.broadcasted_iota(jnp.int32, (slice_rows, LANES), 0)
            zero = jnp.zeros((slice_rows, LANES), jnp.float32)

        def step(s, sq, l1):
            if isinstance(s, int):
                off = s * slice_rows
            else:
                off = pl.multiple_of(s * slice_rows, slice_rows)
            p = pred_ref[pl.ds(off, slice_rows), :].astype(jnp.float32)
            t = tgt_ref[pl.ds(off, slice_rows), :].astype(jnp.float32)
            a = jnp.abs(p - t)                 # one live intermediate per slice
            if masked:
                rid = row_iota + (start_row + off)
                a = jnp.where(rid < rows, a, zero)
            return sq + a * a, l1 + a

        sq, l1 = sq_ref[...], l1_ref[...]
        if outer <= 1:
            for s in range(num_slices):        # short: fully unrolled statically
                sq, l1 = step(s, sq, l1)
        else:
            def body(k, carry):
                sq_c, l1_c = carry
                for j in range(unroll):
                    sq_c, l1_c = step(k * unroll + j, sq_c, l1_c)
                return sq_c, l1_c
            sq, l1 = lax.fori_loop(0, outer, body, (sq, l1))
        sq_ref[...] = sq
        l1_ref[...] = l1

    if not needs_mask:
        # Trace-time guarantee: every grid step covers exactly valid rows.
        accumulate(masked=False)
    else:
        rows_left = rows - start_row

        @pl.when(rows_left >= tile_rows)
        def _():
            accumulate(masked=False)

        @pl.when(rows_left < tile_rows)
        def _():
            accumulate(masked=True)             # partial or fully-OOB tile -> masked to 0


def atom_loss_combinator(pred, target, weight_dict=None,
                         max_tile_bytes=DEFAULT_MAX_TILE_BYTES):
    """JAX/Pallas equivalent of AtomLossCombinator.forward.

    Returns a loss dict mirroring merge_loss_dict's output:
      {"mse_loss": <scalar>, "l1_loss": <scalar>, "total_loss": <scalar>}
    """
    if weight_dict is None:
        weight_dict = {"mse_loss": 1.0, "l1_loss": 1.0}
    w_mse = float(weight_dict.get("mse_loss", 1.0))
    w_l1 = float(weight_dict.get("l1_loss", 1.0))

    assert pred.shape == target.shape
    n_elems = int(pred.size)
    if n_elems == 0:  # guard: avoid 1/0 at trace time
        z = jnp.float32(0.0)
        return {"mse_loss": z, "l1_loss": z, "total_loss": z}

    itemsize = jnp.dtype(pred.dtype).itemsize
    sublane_mult = max(8, 32 // max(1, itemsize))   # f32:8, bf16:16, i8:32
    slice_rows = sublane_mult

    # Lane-dense 2-D view.  No pad for lane-aligned sizes; otherwise a minimal
    # (<128 element) zero pad of BOTH inputs (diff==0 there, contributes 0).
    pred_flat = pred.reshape(-1)
    tgt_flat = target.reshape(-1)
    rem = n_elems % LANES
    if rem:
        # TODO(synk): handle the <128-element lane tail fully in-kernel to
        # avoid this small pad pass as well.
        pad = LANES - rem
        pred_flat = jnp.pad(pred_flat, (0, pad))
        tgt_flat = jnp.pad(tgt_flat, (0, pad))
    rows = pred_flat.shape[0] // LANES
    pred2d = pred_flat.reshape(rows, LANES)
    tgt2d = tgt_flat.reshape(rows, LANES)

    # Byte-based tile sizing (same DMA size for every dtype).
    bytes_per_row = LANES * itemsize
    max_rows = max(slice_rows,
                   (max_tile_bytes // bytes_per_row) // slice_rows * slice_rows)
    tile_rows = min(max_rows, _round_up(rows, slice_rows))

    total_steps = -(-rows // tile_rows)
    # Two-way "parallel" split so v7x can use both TensorCores; harmless
    # (sequential) on single-TC v5e/v6e.
    n_split = 2 if total_steps >= 2 else 1
    steps_per_split = -(-total_steps // n_split)
    needs_mask = (n_split * steps_per_split * tile_rows) != rows
    last_blk = total_steps - 1

    def in_index(c, i):
        # Clamp so fully-out-of-range steps re-read the last valid block;
        # their contribution is zeroed by the in-kernel mask.
        return (jnp.minimum(c * steps_per_split + i, last_blk), 0)

    partial_shape = jax.ShapeDtypeStruct((n_split, slice_rows, LANES), jnp.float32)

    sq_p, l1_p = pl.pallas_call(
        partial(_combinator_kernel,
                tile_rows=tile_rows, slice_rows=slice_rows, rows=rows,
                steps_per_split=steps_per_split, needs_mask=needs_mask),
        out_shape=(partial_shape, partial_shape),
        grid_spec=pltpu.PrefetchScalarGridSpec(
            num_scalar_prefetch=0,
            grid=(n_split, steps_per_split),
            in_specs=[
                pl.BlockSpec((tile_rows, LANES), in_index),   # pred tile
                pl.BlockSpec((tile_rows, LANES), in_index),   # target tile
            ],
            out_specs=(
                pl.BlockSpec((None, slice_rows, LANES), lambda c, i: (c, 0, 0)),
                pl.BlockSpec((None, slice_rows, LANES), lambda c, i: (c, 0, 0)),
            ),
        ),
        compiler_params=pltpu.CompilerParams(
            dimension_semantics=("parallel", "arbitrary"),
            vmem_limit_bytes=VMEM_LIMIT_BYTES,
        ),
    )(pred2d, tgt2d)

    # Tiny final reduction + weighted combine (mirrors merge_loss_dict).
    inv_n = jnp.float32(1.0 / float(n_elems))
    mse = jnp.sum(sq_p) * inv_n
    l1 = jnp.sum(l1_p) * inv_n
    total = jnp.float32(w_mse) * mse + jnp.float32(w_l1) * l1
    return {"mse_loss": mse, "l1_loss": l1, "total_loss": total}


def _reference(pred, target, weight_dict):
    d = pred.astype(jnp.float32) - target.astype(jnp.float32)
    ref_mse = jnp.mean(d * d)
    ref_l1 = jnp.mean(jnp.abs(d))
    ref_total = weight_dict["mse_loss"] * ref_mse + weight_dict["l1_loss"] * ref_l1
    return ref_mse, ref_l1, ref_total


def _check(out, pred, target, weight_dict, rtol, atol):
    ref_mse, ref_l1, ref_total = _reference(pred, target, weight_dict)
    assert jnp.allclose(out["mse_loss"], ref_mse, rtol=rtol, atol=atol)
    assert jnp.allclose(out["l1_loss"], ref_l1, rtol=rtol, atol=atol)
    assert jnp.allclose(out["total_loss"], ref_total, rtol=rtol, atol=atol)


if __name__ == "__main__":
    key = jax.random.PRNGKey(0)
    weight_dict = {"mse_loss": 0.7, "l1_loss": 0.3}
    keys = jax.random.split(key, 10)

    # Case 1: canonical NCHW demo shape (single grid step, no masking, no pad).
    B, C, H, W = 2, 4, 16, 16
    pred = jax.random.normal(keys[0], (B, C, H, W), dtype=jnp.float32)
    target = jax.random.normal(keys[1], (B, C, H, W), dtype=jnp.float32)
    out = atom_loss_combinator(pred, target, weight_dict)
    jax.block_until_ready(out["total_loss"])
    _check(out, pred, target, weight_dict, rtol=1e-5, atol=1e-5)

    # Case 2: non-lane-divisible shape (minimal lane pad) + 2-way split grid.
    pred_b = jax.random.normal(keys[2], (2, 3, 17, 19), dtype=jnp.float32)
    target_b = jax.random.normal(keys[3], (2, 3, 17, 19), dtype=jnp.float32)
    out_b = atom_loss_combinator(pred_b, target_b, weight_dict, max_tile_bytes=4096)
    jax.block_until_ready(out_b["total_loss"])
    _check(out_b, pred_b, target_b, weight_dict, rtol=1e-5, atol=1e-5)

    # Case 3: ragged last tile + fully-OOB padded step -> exercises in-kernel
    # masking and clamped block indices on the split grid.
    pred_c = jax.random.normal(keys[4], (2, 4, 10, 32), dtype=jnp.float32)   # 2560 elems
    target_c = jax.random.normal(keys[5], (2, 4, 10, 32), dtype=jnp.float32)
    out_c = atom_loss_combinator(pred_c, target_c, weight_dict, max_tile_bytes=4096)
    jax.block_until_ready(out_c["total_loss"])
    _check(out_c, pred_c, target_c, weight_dict, rtol=1e-5, atol=1e-5)

    # Case 4: bf16 inputs (sublane packing 16, in-kernel f32 upcast).
    pred_d = jax.random.normal(keys[6], (B, C, H, W), dtype=jnp.bfloat16)
    target_d = jax.random.normal(keys[7], (B, C, H, W), dtype=jnp.bfloat16)
    out_d = atom_loss_combinator(pred_d, target_d, weight_dict)
    jax.block_until_ready(out_d["total_loss"])
    _check(out_d, pred_d, target_d, weight_dict, rtol=1e-4, atol=1e-5)

    # Case 5: multi-slice tiles -> exercises the unrolled fori_loop steady
    # state plus masked tail and an OOB-clamped step.
    pred_e = jax.random.normal(keys[8], (2, 4, 33, 128), dtype=jnp.float32)  # 33792 elems
    target_e = jax.random.normal(keys[9], (2, 4, 33, 128), dtype=jnp.float32)
    out_e = atom_loss_combinator(pred_e, target_e, weight_dict, max_tile_bytes=65536)
    jax.block_until_ready(out_e["total_loss"])
    _check(out_e, pred_e, target_e, weight_dict, rtol=1e-5, atol=1e-5)

    print("KERNEL_OK")
</pallas_src>

<mosaic_0001>
module attributes {stable_mosaic.version = 11 : i64} {
  func.func @_combinator_kernel(%arg0: i32, %arg1: i32, %arg2: memref<16x128xf32, #tpu.memory_space<vmem>>, %arg3: memref<16x128xf32, #tpu.memory_space<vmem>>, %arg4: memref<1x8x128xf32, #tpu.memory_space<vmem>>, %arg5: memref<1x8x128xf32, #tpu.memory_space<vmem>>) attributes {dimension_semantics = [#tpu.dimension_semantics<parallel>, #tpu.dimension_semantics<arbitrary>], iteration_bounds = array<i64: 1, 1>, scalar_prefetch = 0 : i64, scratch_operands = 0 : i64, tpu.core_type = #tpu.core_type<tc>, window_params = [{transform_indices = @transform_0, window_bounds = array<i64: 16, 128>}, {transform_indices = @transform_1, window_bounds = array<i64: 16, 128>}, {transform_indices = @transform_2, window_bounds = array<i64: 1, 8, 128>}, {transform_indices = @transform_3, window_bounds = array<i64: 1, 8, 128>}]} {
    %c0_i32 = arith.constant 0 : i32
    %0 = arith.cmpi eq, %arg1, %c0_i32 : i32
    %1 = arith.extui %0 : i1 to i32
    %c0_i32_0 = arith.constant 0 : i32
    %2 = arith.cmpi ne, %1, %c0_i32_0 : i32
    scf.if %2 {
      %cst = arith.constant 0.000000e+00 : f32
      %27 = vector.broadcast %cst : f32 to vector<8x128xf32>
      %c0_19 = arith.constant 0 : index
      %c0_20 = arith.constant 0 : index
      %c0_21 = arith.constant 0 : index
      %28 = vector.load %arg4[%c0_19, %c0_20, %c0_21] : memref<1x8x128xf32, #tpu.memory_space<vmem>>, vector<1x8x128xf32>
      %29 = vector.shape_cast %28 : vector<1x8x128xf32> to vector<8x128xf32>
      %30 = vector.shape_cast %27 : vector<8x128xf32> to vector<1x8x128xf32>
      tpu.vector_store %arg4[%c0_19, %c0_20, %c0_21], %30 {strides = array<i32>} : memref<1x8x128xf32, #tpu.memory_space<vmem>>, vector<1x8x128xf32>,
      %cst_22 = arith.constant 0.000000e+00 : f32
      %31 = vector.broadcast %cst_22 : f32 to vector<8x128xf32>
      %c0_23 = arith.constant 0 : index
      %c0_24 = arith.constant 0 : index
      %c0_25 = arith.constant 0 : index
      %32 = vector.load %arg5[%c0_23, %c0_24, %c0_25] : memref<1x8x128xf32, #tpu.memory_space<vmem>>, vector<1x8x128xf32>
      %33 = vector.shape_cast %32 : vector<1x8x128xf32> to vector<8x128xf32>
      %34 = vector.shape_cast %31 : vector<8x128xf32> to vector<1x8x128xf32>
      tpu.vector_store %arg5[%c0_23, %c0_24, %c0_25], %34 {strides = array<i32>} : memref<1x8x128xf32, #tpu.memory_space<vmem>>, vector<1x8x128xf32>,
    } else {
    }
    %c0 = arith.constant 0 : index
    %c0_1 = arith.constant 0 : index
    %c0_2 = arith.constant 0 : index
    %3 = vector.load %arg4[%c0, %c0_1, %c0_2] : memref<1x8x128xf32, #tpu.memory_space<vmem>>, vector<1x8x128xf32>
    %4 = vector.shape_cast %3 : vector<1x8x128xf32> to vector<8x128xf32>
    %c0_3 = arith.constant 0 : index
    %c0_4 = arith.constant 0 : index
    %c0_5 = arith.constant 0 : index
    %5 = vector.load %arg5[%c0_3, %c0_4, %c0_5] : memref<1x8x128xf32, #tpu.memory_space<vmem>>, vector<1x8x128xf32>
    %6 = vector.shape_cast %5 : vector<1x8x128xf32> to vector<8x128xf32>
    %c0_6 = arith.constant 0 : index
    %c0_7 = arith.constant 0 : index
    %7 = vector.load %arg2[%c0_6, %c0_7] : memref<16x128xf32, #tpu.memory_space<vmem>>, vector<8x128xf32>
    %c0_8 = arith.constant 0 : index
    %c0_9 = arith.constant 0 : index
    %8 = vector.load %arg3[%c0_8, %c0_9] : memref<16x128xf32, #tpu.memory_space<vmem>>, vector<8x128xf32>
    %9 = arith.subf %7, %8 : vector<8x128xf32>
    %10 = math.absf %9 : vector<8x128xf32>
    %11 = arith.mulf %10, %10 : vector<8x128xf32>
    %12 = arith.addf %4, %11 : vector<8x128xf32>
    %13 = arith.addf %6, %10 : vector<8x128xf32>
    %c8 = arith.constant 8 : index
    %c0_10 = arith.constant 0 : index
    %14 = vector.load %arg2[%c8, %c0_10] : memref<16x128xf32, #tpu.memory_space<vmem>>, vector<8x128xf32>
    %c8_11 = arith.constant 8 : index
    %c0_12 = arith.constant 0 : index
    %15 = vector.load %arg3[%c8_11, %c0_12] : memref<16x128xf32, #tpu.memory_space<vmem>>, vector<8x128xf32>
    %16 = arith.subf %14, %15 : vector<8x128xf32>
    %17 = math.absf %16 : vector<8x128xf32>
    %18 = arith.mulf %17, %17 : vector<8x128xf32>
    %19 = arith.addf %12, %18 : vector<8x128xf32>
    %20 = arith.addf %13, %17 : vector<8x128xf32>
    %c0_13 = arith.constant 0 : index
    %c0_14 = arith.constant 0 : index
    %c0_15 = arith.constant 0 : index
    %21 = vector.load %arg4[%c0_13, %c0_14, %c0_15] : memref<1x8x128xf32, #tpu.memory_space<vmem>>, vector<1x8x128xf32>
    %22 = vector.shape_cast %21 : vector<1x8x128xf32> to vector<8x128xf32>
    %23 = vector.shape_cast %19 : vector<8x128xf32> to vector<1x8x128xf32>
    tpu.vector_store %arg4[%c0_13, %c0_14, %c0_15], %23 {strides = array<i32>} : memref<1x8x128xf32, #tpu.memory_space<vmem>>, vector<1x8x128xf32>,
    %c0_16 = arith.constant 0 : index
    %c0_17 = arith.constant 0 : index
    %c0_18 = arith.constant 0 : index
    %24 = vector.load %arg5[%c0_16, %c0_17, %c0_18] : memref<1x8x128xf32, #tpu.memory_space<vmem>>, vector<1x8x128xf32>
    %25 = vector.shape_cast %24 : vector<1x8x128xf32> to vector<8x128xf32>
    %26 = vector.shape_cast %20 : vector<8x128xf32> to vector<1x8x128xf32>
    tpu.vector_store %arg5[%c0_16, %c0_17, %c0_18], %26 {strides = array<i32>} : memref<1x8x128xf32, #tpu.memory_space<vmem>>, vector<1x8x128xf32>,
    return
  }
  func.func @transform_0(%arg0: i32, %arg1: i32) -> (i32, i32) {
    %c1_i32 = arith.constant 1 : i32
    %0 = arith.muli %arg0, %c1_i32 : i32
    %1 = arith.addi %0, %arg1 : i32
    %c0_i32 = arith.constant 0 : i32
    %2 = arith.minsi %1, %c0_i32 : i32
    %c0_i32_0 = arith.constant 0 : i32
    %c0_i32_1 = arith.constant 0 : i32
    return %2, %c0_i32_0 : i32, i32
  }
  func.func @transform_1(%arg0: i32, %arg1: i32) -> (i32, i32) {
    %c1_i32 = arith.constant 1 : i32
    %0 = arith.muli %arg0, %c1_i32 : i32
    %1 = arith.addi %0, %arg1 : i32
    %c0_i32 = arith.constant 0 : i32
    %2 = arith.minsi %1, %c0_i32 : i32
    %c0_i32_0 = arith.constant 0 : i32
    %c0_i32_1 = arith.constant 0 : i32
    return %2, %c0_i32_0 : i32, i32
  }
  func.func @transform_2(%arg0: i32, %arg1: i32) -> (i32, i32, i32) {
    %c0_i32 = arith.constant 0 : i32
    %c0_i32_0 = arith.constant 0 : i32
    %c0_i32_1 = arith.constant 0 : i32
    return %arg0, %c0_i32, %c0_i32_0 : i32, i32, i32
  }
  func.func @transform_3(%arg0: i32, %arg1: i32) -> (i32, i32, i32) {
    %c0_i32 = arith.constant 0 : i32
    %c0_i32_0 = arith.constant 0 : i32
    %c0_i32_1 = arith.constant 0 : i32
    return %arg0, %c0_i32, %c0_i32_0 : i32, i32, i32
  }
}

</mosaic_0001>

<bundles_post_ra>
// kernel: tpu_custom_call.1
= control target key start
LH: loop header
LB: loop body
LE: loop exit
PB: predicated region body
PF: predicated region fallthrough
CT: control target
= control target key end

     0   :  { %9 = vsyncpa [#allocation3], 0  ;;  %s278_s0 = inlined_call_operand.hbm [shape: f32[16,128], index: 0, kind: input, shape index: {}]   ;;  %s279_s1 = inlined_call_operand.hbm [shape: f32[16,128], index: 1, kind: input, shape index: {}]   ;;  %s280_s2 = inlined_call_operand.hbm [shape: f32[1,8,128], index: 2, kind: output, shape index: {0}]   ;;  %s281_s3 = inlined_call_operand.hbm [shape: f32[1,8,128], index: 3, kind: output, shape index: {1}]  }
   0x1   :  { %10 = vsyncpa [#allocation6], 0 }
   0x2   :  { %11 = vsyncpa [#allocation4], 0 }
   0x3   :  { %12 = vsyncpa [#allocation9], 0  ;;  %s23_s14 = sshll.u32 %s278_s0, 4  ;;  %s240_s15 = smov [#allocation2]   ;;  %s24_s14 = int_to_ptr.hbm [resolvable:$true] %s23_s14 }
   0x4   :  { %s25_s16 = sshll.u32 %s240_s15, 4  ;;  %s42_s19 = sshll.u32 %s279_s1, 4  ;;  %s26_s16 = int_to_ptr.vmem [resolvable:$true] %s25_s16  ;;  %s43_s19 = int_to_ptr.hbm [resolvable:$true] %s42_s19 }
   0x5   :  { %s241_s20 = smov 128   ;;  %s242_s21 = smov 8  }
   0x6   :  { %31 = dma.hbm_to_vmem [thread:$0]  %s24_s14, 256, %s26_s16, [#allocation3], %s241_s20, %s241_s20, %s242_s21  }
   0x7   :  { %s243_s22 = smov [#allocation5]  }
   0x8   :  { %s44_s23 = sshll.u32 %s243_s22, 4  ;;  %s45_s23 = int_to_ptr.vmem [resolvable:$true] %s44_s23 }
   0x9   :  { %50 = dma.hbm_to_vmem [thread:$0]  %s43_s19, 256, %s45_s23, [#allocation6], %s241_s20, %s241_s20, %s242_s21  }
   0xa   :  { %232 = dma.done.wait [#allocation3], 256  }
   0xb   :  { %233 = vsyncadd [#allocation3], 4294967040 }
   0xc   :  { %234 = dma.done.wait [#allocation6], 256  }
   0xd   :  { %235 = vsyncadd [#allocation6], 4294967040  ;;  %v75_v0 = vld [vmem:[#allocation2] sm:$0xff]  ;;  %v76_v1 = vld [vmem:[#allocation5] sm:$0xff]  ;;  %s244_s0 = smov [#allocation8]   ;;  %s109_s26 = sshll.u32 %s281_s3, 4  ;;  %s110_s26 = int_to_ptr.hbm [resolvable:$true] %s109_s26 }
   0xe   :  { %v82_v2 = vld [vmem:[#allocation2 + $0x8] sm:$0xff]  ;;  %v77_v3 = vsub.f32 %v75_v0, %v76_v1  ;;  %v83_v4 = vld [vmem:[#allocation5 + $0x8] sm:$0xff]  ;;  %s107_s1 = sshll.u32 %s244_s0, 4  ;;  %s245_s27 = smov [#allocation7]   ;;  %s108_s1 = int_to_ptr.vmem [resolvable:$true] %s107_s1 }
   0xf   :  { %v84_v5 = vsub.f32 %v82_v2, %v83_v4  ;;  %s96_s28 = sshll.u32 %s245_s27, 4  ;;  %s98_s4 = sshll.u32 %s280_s2, 4  ;;  %s97_s28 = int_to_ptr.vmem [resolvable:$true] %s96_s28  ;;  %s99_s4 = int_to_ptr.hbm [resolvable:$true] %s98_s4 }
  0x10   :  { %v78_v6 = vand.u32 2147483647, %v77_v3 }
  0x11   :  { %v85_v7 = vand.u32 2147483647, %v84_v5 }
  0x12   :  { %v79_v8 = vmul.f32 %v78_v6, %v78_v6 }
  0x13   :  { %v86_v9 = vmul.f32 %v85_v7, %v85_v7  ;;  %v88_v10 = vadd.f32 %v85_v7, %v78_v6 }
  0x15   :  { %v87_v11 = vadd.f32 %v86_v9, %v79_v8  ;;  %90 = vst [vmem:[#allocation8] sm:$0xff] %v88_v10 }
  0x16   :  { %112 = dma.vmem_to_hbm [thread:$0]  %s108_s1, 128, %s110_s26, [#allocation9]  }
  0x17   :  { %89 = vst [vmem:[#allocation7] sm:$0xff] %v87_v11 }
  0x18   :  { %101 = dma.vmem_to_hbm [thread:$0]  %s97_s28, 128, %s99_s4, [#allocation4]  }
  0x19   :  { %236 = dma.done.wait [#allocation4], 128  }
  0x1a   :  { %237 = vsyncadd [#allocation4], 4294967168 }
  0x1b   :  { %238 = dma.done.wait [#allocation9], 128  }
  0x1c   :  { %239 = vsyncadd [#allocation9], 4294967168 }
  0x1d   :  { %121 = vsyncpa [#allocation3], 1 }
  0x1e   :  { %122 = vsyncpa [#allocation6], 1 }
  0x1f   :  { %123 = vsyncpa [#allocation4], 1 }
  0x20   :  { %124 = vsyncpa [#allocation9], 1 }

</bundles_post_ra>
